<compile_context>
chip_gen: v7x
topology: tpu7x:2x2x1
jax: 0.10.0
libtpu: 0.0.40
codegen_flags: <defaults>
</compile_context>

<pallas_src>
import functools
import re

import numpy as np
import jax
import jax.numpy as jnp
from jax.experimental import pallas as pl
from jax.experimental.pallas import tpu as pltpu


_TILE = 512          # row tile for the fused stream kernel (was 128)
_HID_PAD = 128       # hidden padded to a full lane width
_COUT_STORE = 8      # per-pixel output channels stored (3 padded to 8, bf16)
_R_TILE = 8          # rotations per correlate grid step


def _round_up(x, m):
    return ((x + m - 1) // m) * m


# ----------------------------------------------------------------------------
# Pallas kernels
# ----------------------------------------------------------------------------
def _stream_kernel(sid_ref, x_ref, w1_ref, b1_ref, w2_ref, b2_ref, o_ref):
    """Fused key/query ConceptFusion stream on one 512-row pixel tile.

    The language embedding is pre-folded into w2 on the host, so the body is
    relu(x @ w1 + b1) @ w2 + b2.  Which weight set (key vs. query) this tile
    uses is decided by the scalar-prefetched `sid` array inside the BlockSpec
    index_maps, so `sid_ref` is unused here.

      x : (TILE, Cin) bf16   w1: (Cin, 128) bf16   b1: (1, 128) f32
      w2: (128, 8)   bf16    b2: (1, 8)     f32    o : (TILE, 8) bf16
    """
    del sid_ref
    h = jnp.dot(x_ref[...], w1_ref[...], preferred_element_type=jnp.float32)
    h = jnp.maximum(h + b1_ref[...], 0.0)
    y = jnp.dot(h.astype(jnp.bfloat16), w2_ref[...],
                preferred_element_type=jnp.float32) + b2_ref[...]
    o_ref[...] = y.astype(jnp.bfloat16)


def _conv_kernel(x4_ref, wk_ref, o_ref, acc_ref, *, ow, ks, npix_pad):
    """One kernel-row (dy) step of the conv, all rotations of this tile at once.

      x4 : (M_pad, XLEN_pad)  bf16  width-lowered padded logits (resident)
      wk : (R_TILE, M_pad)    bf16  conv weights for this (dy, rotation-tile)
      o  : (R_TILE, NPIX_pad) f32   flattened conv output for this tile
      acc: (R_TILE, NPIX_pad) f32   VMEM accumulator (single live accumulator)
    """
    dy = pl.program_id(1)

    @pl.when(dy == 0)
    def _():
        acc_ref[...] = jnp.zeros_like(acc_ref)

    xs = x4_ref[:, pl.ds(dy * ow, npix_pad)]          # (M_pad, NPIX_pad) bf16
    acc_ref[...] += jnp.dot(wk_ref[...], xs, preferred_element_type=jnp.float32)

    @pl.when(dy == ks - 1)
    def _():
        o_ref[...] = acc_ref[...]


def _interp_kernel(conv_ref, wr_ref, wct_ref, o_ref):
    """Separable bilinear interpolation + crop on the MXU:  out_r = Wr @ conv_r @ Wc^T.

      conv: (R_TILE, OH, OW) f32   wr: (OUT_H, OH) f32   wct: (OW, OUT_W) f32
      o   : (R_TILE, OUT_H, OUT_W) f32
    """
    wr = wr_ref[...]
    wct = wct_ref[...]
    for r in range(conv_ref.shape[0]):
        t1 = jnp.dot(wr, conv_ref[r], preferred_element_type=jnp.float32)
        o_ref[r] = jnp.dot(t1, wct, preferred_element_type=jnp.float32)


def _softmax_kernel(s_ref, o_ref):
    """Global softmax finalize over all rotations / pixels (small, fully resident)."""
    s = s_ref[...]
    m = jnp.max(s)
    e = jnp.exp(s - m)
    o_ref[...] = e * (1.0 / jnp.sum(e))


# ----------------------------------------------------------------------------
# Host-side helpers (glue)
# ----------------------------------------------------------------------------
def _bilinear_matrix(out_size, in_size):
    """Row-weight matrix equivalent to F.interpolate(mode='bilinear', align_corners=False)."""
    scale = in_size / out_size
    idx = np.arange(out_size, dtype=np.float64)
    src = np.maximum((idx + 0.5) * scale - 0.5, 0.0)
    i0 = np.minimum(np.floor(src).astype(np.int64), in_size - 1)
    i1 = np.minimum(i0 + 1, in_size - 1)
    w1 = src - i0
    w0 = 1.0 - w1
    W = np.zeros((out_size, in_size), dtype=np.float64)
    rows = idx.astype(np.int64)
    W[rows, i0] += w0
    W[rows, i1] += w1
    return W.astype(np.float32)


def _rotate_about_pivot(img_chw, angle_deg, pivot):
    """Bilinear rotation of a CHW image about a (row, col) pivot, zero padded."""
    # TODO(synk): exact kornia/utils.ImageRotator angle-sign & pivot (x,y) convention not reproduced bit-exactly.
    C, H, W = img_chw.shape
    th = jnp.float32(np.deg2rad(angle_deg))
    cs, sn = jnp.cos(th), jnp.sin(th)
    yy, xx = jnp.meshgrid(jnp.arange(H, dtype=jnp.float32),
                          jnp.arange(W, dtype=jnp.float32), indexing="ij")
    y0 = yy - float(pivot[0])
    x0 = xx - float(pivot[1])
    sy = cs * y0 + sn * x0 + float(pivot[0])
    sx = -sn * y0 + cs * x0 + float(pivot[1])
    yf = jnp.floor(sy)
    xf = jnp.floor(sx)
    wy = sy - yf
    wx = sx - xf

    def samp(yi, xi):
        valid = (yi >= 0) & (yi <= H - 1) & (xi >= 0) & (xi <= W - 1)
        yc = jnp.clip(yi, 0, H - 1).astype(jnp.int32)
        xc = jnp.clip(xi, 0, W - 1).astype(jnp.int32)
        return jnp.where(valid[None], img_chw[:, yc, xc], 0.0)

    v00 = samp(yf, xf)
    v01 = samp(yf, xf + 1)
    v10 = samp(yf + 1, xf)
    v11 = samp(yf + 1, xf + 1)
    top = v00 * (1.0 - wx)[None] + v01 * wx[None]
    bot = v10 * (1.0 - wx)[None] + v11 * wx[None]
    return top * (1.0 - wy)[None] + bot * wy[None]


def _lang_embed(text, hidden):
    """Deterministic synthetic language embedding (stand-in for CLIP/ConceptFusion features)."""
    seed = 0
    for ch in text:
        seed = (seed * 131 + ord(ch)) % (2 ** 31 - 1)
    k = jax.random.PRNGKey(seed)
    return 1.0 + 0.1 * jax.random.normal(k, (1, hidden), jnp.float32)


# ----------------------------------------------------------------------------
# Module
# ----------------------------------------------------------------------------
class OneStreamTransportConceptFusionPallas:
    """Transport (place) module with language fused at the bottleneck — Pallas TPU version."""

    def __init__(self, in_shape, n_rotations, crop_size, hidden=32, seed=0):
        self.in_shape = tuple(int(v) for v in in_shape)   # (H, W, C)
        self.n_rotations = int(n_rotations)
        self.crop_size = int(crop_size)
        self.pad_size = int(crop_size // 2)
        self.output_dim = 3
        self.kernel_dim = 3
        self.hidden = int(hidden)
        self.keywords = {"on", "in", "to", "into", "from"}
        self.pattern = r"\b(" + "|".join(self.keywords) + r")\b"
        assert self.hidden <= _HID_PAD
        assert max(self.output_dim, self.kernel_dim) <= _COUT_STORE

        C = self.in_shape[2]
        key = jax.random.PRNGKey(seed)
        k_key, q_key = jax.random.split(key)
        # TODO(synk): real key/query FCN backbones (models.names[...]) are config-defined;
        #             a synthetic 1x1-conv -> ReLU -> lang-fuse -> 1x1-conv stand-in is used.
        self.key_params = self._init_stream(k_key, C, self.hidden, self.output_dim)
        self.query_params = self._init_stream(q_key, C, self.hidden, self.kernel_dim)

        # Separable bilinear-interp (+ crop) matrices, kept in f32 for precision.
        pad = self.pad_size
        HP = self.in_shape[0] + 2 * pad          # padded image fed to the key stream
        WP = self.in_shape[1] + 2 * pad
        OH = HP + 2 * pad - self.crop_size + 1   # conv2d output height
        OW = WP + 2 * pad - self.crop_size + 1
        self._HP, self._WP, self._OH, self._OW = HP, WP, OH, OW
        self._OUT_H = HP - 2 * pad
        self._OUT_W = WP - 2 * pad
        Wr = _bilinear_matrix(HP, OH)[pad:HP - pad]          # (OUT_H, OH)
        Wc = _bilinear_matrix(WP, OW)[pad:WP - pad]          # (OUT_W, OW)
        self._Wr = jnp.asarray(Wr, jnp.float32)              # (OUT_H, OH)
        self._WcT = jnp.asarray(Wc.T, jnp.float32)           # (OW, OUT_W)

    @staticmethod
    def _init_stream(key, cin, hidden, cout):
        k1, k2 = jax.random.split(key)
        w1 = jax.random.normal(k1, (cin, hidden), jnp.float32) / np.sqrt(cin)
        b1 = jnp.zeros((1, hidden), jnp.float32)
        w2 = jax.random.normal(k2, (hidden, cout), jnp.float32) / np.sqrt(hidden)
        b2 = jnp.zeros((1, cout), jnp.float32)
        return (w1, b1, w2, b2)

    # ---- both streams fused into one row-tiled pallas_call --------------------
    def _run_streams(self, x_key, x_query, key_lang, query_lang):
        w1k, b1k, w2k, b2k = self.key_params
        w1q, b1q, w2q, b2q = self.query_params
        cin = w1k.shape[0]

        # Fold language into w2:  (h * lang) @ w2 == h @ (lang^T * w2).
        w2k_f = w2k * key_lang.reshape(-1, 1)
        w2q_f = w2q * query_lang.reshape(-1, 1)

        def pad2(a, rows, cols):
            return jnp.pad(a, ((0, rows - a.shape[0]), (0, cols - a.shape[1])))

        w1_stk = jnp.stack([pad2(w1k, cin, _HID_PAD),
                            pad2(w1q, cin, _HID_PAD)]).astype(jnp.bfloat16)          # (2,cin,128)
        b1_stk = jnp.stack([pad2(b1k, 1, _HID_PAD), pad2(b1q, 1, _HID_PAD)])          # (2,1,128)
        w2_stk = jnp.stack([pad2(w2k_f, _HID_PAD, _COUT_STORE),
                            pad2(w2q_f, _HID_PAD, _COUT_STORE)]).astype(jnp.bfloat16)  # (2,128,8)
        b2_stk = jnp.stack([pad2(b2k, 1, _COUT_STORE), pad2(b2q, 1, _COUT_STORE)])     # (2,1,8)

        nk, nq = x_key.shape[0], x_query.shape[0]
        nk_pad = pl.cdiv(nk, _TILE) * _TILE
        nq_pad = pl.cdiv(nq, _TILE) * _TILE
        x_all = jnp.concatenate(
            [jnp.pad(x_key, ((0, nk_pad - nk), (0, 0))),
             jnp.pad(x_query, ((0, nq_pad - nq), (0, 0)))], axis=0).astype(jnp.bfloat16)
        sid = jnp.asarray([0] * (nk_pad // _TILE) + [1] * (nq_pad // _TILE), jnp.int32)
        n_tiles = (nk_pad + nq_pad) // _TILE

        out = pl.pallas_call(
            _stream_kernel,
            out_shape=jax.ShapeDtypeStruct((nk_pad + nq_pad, _COUT_STORE), jnp.bfloat16),
            grid_spec=pltpu.PrefetchScalarGridSpec(
                num_scalar_prefetch=1,
                grid=(n_tiles,),
                in_specs=[
                    pl.BlockSpec((_TILE, cin), lambda i, s: (i, 0)),
                    pl.BlockSpec((None, cin, _HID_PAD), lambda i, s: (s[i], 0, 0)),
                    pl.BlockSpec((None, 1, _HID_PAD), lambda i, s: (s[i], 0, 0)),
                    pl.BlockSpec((None, _HID_PAD, _COUT_STORE), lambda i, s: (s[i], 0, 0)),
                    pl.BlockSpec((None, 1, _COUT_STORE), lambda i, s: (s[i], 0, 0)),
                ],
                out_specs=pl.BlockSpec((_TILE, _COUT_STORE), lambda i, s: (i, 0)),
            ),
            compiler_params=pltpu.CompilerParams(
                dimension_semantics=("parallel",),
                vmem_limit_bytes=32 * 1024 * 1024),
        )(sid, x_all, w1_stk, b1_stk, w2_stk, b2_stk)

        key_out = out[:nk, :self.output_dim]
        query_out = out[nk_pad:nk_pad + nq, :self.kernel_dim]
        return key_out, query_out

    # ---- correlate: MXU conv + separable bilinear interp/crop + global softmax ----
    def correlate(self, logits, kernel, softmax):
        CO, HP, WP = logits.shape
        R = kernel.shape[0]
        KS = self.crop_size
        pad = self.pad_size
        HPP, WPP = HP + 2 * pad, WP + 2 * pad
        OH, OW = self._OH, self._OW
        OUT_H, OUT_W = self._OUT_H, self._OUT_W

        M = CO * KS                                   # conv contraction depth per dy
        M_pad = _round_up(M, 32)
        NPIX = OH * OW
        NPIX_pad = _round_up(NPIX, 128)
        XLEN = HPP * OW
        XLEN_pad = _round_up(max(XLEN, (KS - 1) * OW + NPIX_pad), 128)
        R_pad = _round_up(R, _R_TILE)
        n_rt = R_pad // _R_TILE

        # Width-lowered conv operand (host layout plumbing):
        #   x4[c*KS + dx, y*OW + x] = pad(logits)[c, y, x + dx]
        # so that conv[r, y, x] = sum_dy (W_dy @ x4[:, dy*OW:])[r, y*OW + x].
        # TODO(synk): at production sizes build this per output-pixel tile inside
        #             the kernel instead of materializing it in HBM.
        lpad = jnp.pad(logits.astype(jnp.bfloat16), ((0, 0), (pad, pad), (pad, pad)))
        x4 = jnp.stack([lpad[:, :, dx:dx + OW] for dx in range(KS)], axis=1)   # (CO,KS,HPP,OW)
        x4 = x4.reshape(M, XLEN)
        x4 = jnp.pad(x4, ((0, M_pad - M), (0, XLEN_pad - XLEN)))

        # Conv weights as bf16 VMEM blocks: one (R_TILE, M_pad) block per (dy, rotation-tile).
        wk = jnp.transpose(kernel, (2, 0, 1, 3)).reshape(KS, R, M)    # (dy, r, c*KS+dx)
        wk = jnp.pad(wk, ((0, 0), (0, R_pad - R), (0, M_pad - M)))
        wk = wk.reshape(KS * n_rt, _R_TILE, M_pad).astype(jnp.bfloat16)

        conv_flat = pl.pallas_call(
            functools.partial(_conv_kernel, ow=OW, ks=KS, npix_pad=NPIX_pad),
            out_shape=jax.ShapeDtypeStruct((R_pad, NPIX_pad), jnp.float32),
            grid_spec=pltpu.PrefetchScalarGridSpec(
                num_scalar_prefetch=0,
                grid=(n_rt, KS),
                in_specs=[
                    pl.BlockSpec((M_pad, XLEN_pad), lambda rt, dy: (0, 0)),
                    pl.BlockSpec((None, _R_TILE, M_pad),
                                 lambda rt, dy, n_rt=n_rt: (dy * n_rt + rt, 0, 0)),
                ],
                out_specs=pl.BlockSpec((_R_TILE, NPIX_pad), lambda rt, dy: (rt, 0)),
                scratch_shapes=[pltpu.VMEM((_R_TILE, NPIX_pad), jnp.float32)],
            ),
            compiler_params=pltpu.CompilerParams(
                dimension_semantics=("parallel", "arbitrary"),
                vmem_limit_bytes=32 * 1024 * 1024),
        )(x4, wk)

        conv = conv_flat[:, :NPIX].reshape(R_pad, OH, OW)     # host layout plumbing

        scores = pl.pallas_call(
            _interp_kernel,
            out_shape=jax.ShapeDtypeStruct((R_pad, OUT_H, OUT_W), jnp.float32),
            grid=(n_rt,),
            in_specs=[
                pl.BlockSpec((_R_TILE, OH, OW), lambda rt: (rt, 0, 0)),
                pl.BlockSpec((OUT_H, OH), lambda rt: (0, 0)),
                pl.BlockSpec((OW, OUT_W), lambda rt: (0, 0)),
            ],
            out_specs=pl.BlockSpec((_R_TILE, OUT_H, OUT_W), lambda rt: (rt, 0, 0)),
            compiler_params=pltpu.CompilerParams(
                dimension_semantics=("parallel",),
                vmem_limit_bytes=32 * 1024 * 1024),
        )(conv, self._Wr, self._WcT)

        scores = scores[:R]
        if not softmax:
            return scores[None]          # (1, R, H, W) — matches the PyTorch non-softmax branch

        flat = scores.reshape(R * OUT_H, OUT_W)
        probs = pl.pallas_call(
            _softmax_kernel,
            out_shape=jax.ShapeDtypeStruct((R * OUT_H, OUT_W), jnp.float32),
            grid=(1,),
            in_specs=[pl.BlockSpec((R * OUT_H, OUT_W), lambda i: (0, 0))],
            out_specs=pl.BlockSpec((R * OUT_H, OUT_W), lambda i: (0, 0)),
            compiler_params=pltpu.CompilerParams(
                vmem_limit_bytes=32 * 1024 * 1024),
        )(flat)
        return probs.reshape(R, OUT_H, OUT_W)    # (R, H, W) — matches the PyTorch softmax branch

    # ---- transport: language parsing + fused streams ----
    def transport(self, in_tensor, crop, l, sim):
        sentence = re.sub(r"^\S+\s*", "", l)
        match = re.search(self.pattern, sentence)
        if match:
            query_l = sentence[:match.start()].strip()
            key_l = sentence[match.end():].strip()
        else:
            query_l = key_l = sentence

        _, C, HP, WP = in_tensor.shape
        R, _, KS, _ = crop.shape
        x_key = jnp.transpose(in_tensor[0], (1, 2, 0)).reshape(HP * WP, C)
        x_query = jnp.transpose(crop, (0, 2, 3, 1)).reshape(R * KS * KS, C)

        key_out, query_out = self._run_streams(
            x_key, x_query,
            _lang_embed(key_l, self.hidden), _lang_embed(query_l, self.hidden))

        logits = key_out.reshape(HP, WP, self.output_dim).transpose(2, 0, 1)        # (CO, HP, WP)
        kern = query_out.reshape(R, KS, KS, self.kernel_dim).transpose(0, 3, 1, 2)  # (R, CO, KS, KS)
        return logits, kern

    # ---- forward ----
    def forward(self, inp_img, p, lang_goal, sim, softmax=True):
        pad = self.pad_size
        img = jnp.pad(jnp.asarray(inp_img, jnp.float32),
                      ((pad, pad), (pad, pad), (0, 0)))          # (HP, WP, C)
        in_tensor = jnp.transpose(img, (2, 0, 1))[None]          # NCHW (1, C, HP, WP)

        pv = (int(p[0]) + pad, int(p[1]) + pad)
        hcrop = pad
        crops = []
        for i in range(self.n_rotations):
            angle = i * 360.0 / self.n_rotations
            rot = _rotate_about_pivot(in_tensor[0], angle, pv)   # (C, HP, WP)
            crops.append(rot[:, pv[0] - hcrop:pv[0] + hcrop, pv[1] - hcrop:pv[1] + hcrop])
        crop = jnp.stack(crops, axis=0)                          # (R, C, KS, KS)

        logits, kern = self.transport(in_tensor, crop, lang_goal, sim)
        return self.correlate(logits, kern, softmax)


# ----------------------------------------------------------------------------
# Demo
# ----------------------------------------------------------------------------
if __name__ == "__main__":
    key = jax.random.PRNGKey(0)
    in_shape = (16, 16, 4)          # (H, W, C)
    n_rotations = 4
    crop_size = 8

    model = OneStreamTransportConceptFusionPallas(
        in_shape=in_shape, n_rotations=n_rotations, crop_size=crop_size, hidden=32, seed=0)

    inp_img = jax.random.normal(key, in_shape, jnp.float32)
    p = (7, 9)
    lang_goal = "put the red block on the blue bowl"

    out = model.forward(inp_img, p, lang_goal, sim=None, softmax=True)
    out = jax.block_until_ready(out)

    assert out.shape == (n_rotations, in_shape[0], in_shape[1]), out.shape
    assert bool(jnp.isfinite(out).all())
    assert abs(float(jnp.sum(out)) - 1.0) < 1e-3   # global softmax normalization
    print("KERNEL_OK")
</pallas_src>

<mosaic_0001>
module attributes {stable_mosaic.version = 11 : i64} {
  func.func @_stream_kernel(%arg0: i32, %arg1: memref<3xi32, #tpu.memory_space<smem>>, %arg2: memref<512x4xbf16, #tpu.memory_space<vmem>>, %arg3: memref<1x4x128xbf16, #tpu.memory_space<vmem>>, %arg4: memref<1x1x128xf32, #tpu.memory_space<vmem>>, %arg5: memref<1x128x8xbf16, #tpu.memory_space<vmem>>, %arg6: memref<1x1x8xf32, #tpu.memory_space<vmem>>, %arg7: memref<512x8xbf16, #tpu.memory_space<vmem>>) attributes {dimension_semantics = [#tpu.dimension_semantics<parallel>], iteration_bounds = array<i64: 3>, scalar_prefetch = 1 : i64, scratch_operands = 0 : i64, tpu.core_type = #tpu.core_type<tc>, window_params = [{transform_indices = @transform_0, window_bounds = array<i64: 512, 4>}, {transform_indices = @transform_1, window_bounds = array<i64: 1, 4, 128>}, {transform_indices = @transform_2, window_bounds = array<i64: 1, 1, 128>}, {transform_indices = @transform_3, window_bounds = array<i64: 1, 128, 8>}, {transform_indices = @transform_4, window_bounds = array<i64: 1, 1, 8>}, {transform_indices = @transform_5, window_bounds = array<i64: 512, 8>}]} {
    %c0 = arith.constant 0 : index
    %c0_0 = arith.constant 0 : index
    %0 = vector.load %arg2[%c0, %c0_0] : memref<512x4xbf16, #tpu.memory_space<vmem>>, vector<512x4xbf16>
    %c0_1 = arith.constant 0 : index
    %c0_2 = arith.constant 0 : index
    %c0_3 = arith.constant 0 : index
    %1 = vector.load %arg3[%c0_1, %c0_2, %c0_3] : memref<1x4x128xbf16, #tpu.memory_space<vmem>>, vector<1x4x128xbf16>
    %2 = vector.shape_cast %1 : vector<1x4x128xbf16> to vector<4x128xbf16>
    %cst = arith.constant dense<0.000000e+00> : vector<512x128xf32>
    %3 = tpu.matmul %0, %2, %cst {dimension_numbers = #tpu.dot_dimension_numbers<[1], [0], [0], [1], [0, 0, 1, 1], [], []>} : vector<512x4xbf16>, vector<4x128xbf16>, vector<512x128xf32> -> vector<512x128xf32>
    %c0_4 = arith.constant 0 : index
    %c0_5 = arith.constant 0 : index
    %c0_6 = arith.constant 0 : index
    %4 = vector.load %arg4[%c0_4, %c0_5, %c0_6] : memref<1x1x128xf32, #tpu.memory_space<vmem>>, vector<1x1x128xf32>
    %5 = vector.shape_cast %4 : vector<1x1x128xf32> to vector<1x128xf32>
    %6 = vector.broadcast %5 : vector<1x128xf32> to vector<512x128xf32>
    %7 = arith.addf %3, %6 : vector<512x128xf32>
    %cst_7 = arith.constant 0.000000e+00 : f32
    %8 = vector.broadcast %cst_7 : f32 to vector<512x128xf32>
    %9 = arith.maximumf %7, %8 : vector<512x128xf32>
    %10 = arith.truncf %9 : vector<512x128xf32> to vector<512x128xbf16>
    %c0_8 = arith.constant 0 : index
    %c0_9 = arith.constant 0 : index
    %c0_10 = arith.constant 0 : index
    %11 = vector.load %arg5[%c0_8, %c0_9, %c0_10] : memref<1x128x8xbf16, #tpu.memory_space<vmem>>, vector<1x128x8xbf16>
    %12 = vector.shape_cast %11 : vector<1x128x8xbf16> to vector<128x8xbf16>
    %cst_11 = arith.constant dense<0.000000e+00> : vector<512x8xf32>
    %13 = tpu.matmul %10, %12, %cst_11 {dimension_numbers = #tpu.dot_dimension_numbers<[1], [0], [0], [1], [0, 0, 1, 1], [], []>} : vector<512x128xbf16>, vector<128x8xbf16>, vector<512x8xf32> -> vector<512x8xf32>
    %c0_12 = arith.constant 0 : index
    %c0_13 = arith.constant 0 : index
    %c0_14 = arith.constant 0 : index
    %14 = vector.load %arg6[%c0_12, %c0_13, %c0_14] : memref<1x1x8xf32, #tpu.memory_space<vmem>>, vector<1x1x8xf32>
    %15 = vector.shape_cast %14 : vector<1x1x8xf32> to vector<1x8xf32>
    %16 = vector.broadcast %15 : vector<1x8xf32> to vector<512x8xf32>
    %17 = arith.addf %13, %16 : vector<512x8xf32>
    %18 = arith.truncf %17 : vector<512x8xf32> to vector<512x8xbf16>
    %c0_15 = arith.constant 0 : index
    %c0_16 = arith.constant 0 : index
    %19 = vector.load %arg7[%c0_15, %c0_16] : memref<512x8xbf16, #tpu.memory_space<vmem>>, vector<512x8xbf16>
    tpu.vector_store %arg7[%c0_15, %c0_16], %18 {strides = array<i32>} : memref<512x8xbf16, #tpu.memory_space<vmem>>, vector<512x8xbf16>,
    return
  }
  func.func @transform_0(%arg0: i32, %arg1: memref<3xi32, #tpu.memory_space<smem>>) -> (i32, i32) {
    %c0_i32 = arith.constant 0 : i32
    %c0_i32_0 = arith.constant 0 : i32
    return %arg0, %c0_i32 : i32, i32
  }
  func.func @transform_1(%arg0: i32, %arg1: memref<3xi32, #tpu.memory_space<smem>>) -> (i32, i32, i32) {
    %0 = arith.index_cast %arg0 : i32 to index
    %1 = memref.load %arg1[%0] : memref<3xi32, #tpu.memory_space<smem>>
    %c0_i32 = arith.constant 0 : i32
    %c0_i32_0 = arith.constant 0 : i32
    %c0_i32_1 = arith.constant 0 : i32
    return %1, %c0_i32, %c0_i32_0 : i32, i32, i32
  }
  func.func @transform_2(%arg0: i32, %arg1: memref<3xi32, #tpu.memory_space<smem>>) -> (i32, i32, i32) {
    %0 = arith.index_cast %arg0 : i32 to index
    %1 = memref.load %arg1[%0] : memref<3xi32, #tpu.memory_space<smem>>
    %c0_i32 = arith.constant 0 : i32
    %c0_i32_0 = arith.constant 0 : i32
    %c0_i32_1 = arith.constant 0 : i32
    return %1, %c0_i32, %c0_i32_0 : i32, i32, i32
  }
  func.func @transform_3(%arg0: i32, %arg1: memref<3xi32, #tpu.memory_space<smem>>) -> (i32, i32, i32) {
    %0 = arith.index_cast %arg0 : i32 to index
    %1 = memref.load %arg1[%0] : memref<3xi32, #tpu.memory_space<smem>>
    %c0_i32 = arith.constant 0 : i32
    %c0_i32_0 = arith.constant 0 : i32
    %c0_i32_1 = arith.constant 0 : i32
    return %1, %c0_i32, %c0_i32_0 : i32, i32, i32
  }
  func.func @transform_4(%arg0: i32, %arg1: memref<3xi32, #tpu.memory_space<smem>>) -> (i32, i32, i32) {
    %0 = arith.index_cast %arg0 : i32 to index
    %1 = memref.load %arg1[%0] : memref<3xi32, #tpu.memory_space<smem>>
    %c0_i32 = arith.constant 0 : i32
    %c0_i32_0 = arith.constant 0 : i32
    %c0_i32_1 = arith.constant 0 : i32
    return %1, %c0_i32, %c0_i32_0 : i32, i32, i32
  }
  func.func @transform_5(%arg0: i32, %arg1: memref<3xi32, #tpu.memory_space<smem>>) -> (i32, i32) {
    %c0_i32 = arith.constant 0 : i32
    %c0_i32_0 = arith.constant 0 : i32
    return %arg0, %c0_i32 : i32, i32
  }
}

</mosaic_0001>

<bundles_post_ra>
// kernel: tpu_custom_call.1
= control target key start
LH: loop header
LB: loop body
LE: loop exit
PB: predicated region body
PF: predicated region fallthrough
CT: control target
= control target key end

     0   :  { %s2770_s0 = inlined_call_operand.vmem [shape: s32[3], index: 0, kind: input, shape index: {}]   ;;  %s2771_s1 = inlined_call_operand.vmem [shape: bf16[1536,4], index: 1, kind: input, shape index: {}]   ;;  %s2772_s2 = inlined_call_operand.vmem [shape: bf16[2,4,128], index: 2, kind: input, shape index: {}]   ;;  %s2773_s3 = inlined_call_operand.vmem [shape: f32[2,1,128], index: 3, kind: input, shape index: {}]   ;;  %s2774_s4 = inlined_call_operand.vmem [shape: bf16[2,128,8], index: 4, kind: input, shape index: {}]   ;;  %s2775_s5 = inlined_call_operand.vmem [shape: f32[2,1,8], index: 5, kind: input, shape index: {}]   ;;  %s2776_s6 = inlined_call_operand.vmem [shape: bf16[1536,8], index: 6, kind: output, shape index: {}]  }
   0x1   :  { %s11_s23 = sshll.u32 %s2770_s0, 4  ;;  %s12_s23 = int_to_ptr.vmem [resolvable:$true] %s11_s23 }
   0x2   :  { %s2328_s24 = scalar_lea.vmem %s12_s23, 16  ;;  %p2333_p1 = scmp.lt.s32.totalorder %s12_s23, %s12_s23 }
   0x3   :  { %p2329_p0 = scmp.ne.s32.totalorder %s12_s23, %s2328_s24  ;;  %p2334_p2 = scmp.lt.s32.totalorder %s2328_s24, %s2328_s24 }
   0x5   :  { %p2335_p3 = por %p2334_p2, %p2333_p1 }
   0x7   :  { %p2336_p4 = pnand %p2335_p3, %p2329_p0 }
   0x9   :  { %2339 = shalt.err (!%p2336_p4)  }
   0xa   :  { %s2350_s25 = smov [#allocation3]  }
   0xb   :  { %14 = dma.vmem_to_smem %s12_s23, 16, %s2350_s25, [#allocation2] }
   0xc   :  { %2344 = dma.done.wait [#allocation2], 16 }
   0xd   :  { %2345 = vsyncadd [#allocation2], 4294967280 }
   0xe   :  { %16 = sfence }
   0xf   :  { %s2389_s26 = smov 0  }
  0x10 LB: > { %s2395_s0 = sadd.s32 4294967295, %s2348_s26   ;;  %p1830_p5 = scmp.ge.s32.totalorder %s2348_s26, 1  ;;  %s2348_s26 = sphi %s2389_s26, %s22_s26  }
  0x11   : > { %p246_p6 = scmp.lt.s32.totalorder %s2348_s26, 4 }
  0x13   : > { %p247_p7 = pnand %p1830_p5, %p246_p6 }
  0x14   : > { %s299_s27 = sld [smem:[#allocation3 + %s2395_s0]] (!%p247_p7)  ;;  %s1831_s28 = sshll.u32 (!%p247_p7), %s2395_s0, 6  ;;  %vm561_vm0 = vcmask (!%p247_p7), 31744   ;;  %vm658_vm1 = vcmask (!%p247_p7), 1041408   ;;  %vm1663_vm2 = vcmask (!%p247_p7), 60416  }
  0x15   : > { %250 = sbr.rel (%p247_p7) target bundleno = 599 (0x257), region = 40  ;;  %p294_p8 = scmp.lt.s32.totalorder (!%p247_p7), %s1831_s28, 191 }
  0x16   : > { %s310_s13 = sld [smem:[#allocation3 + %s2395_s0]] (!%p247_p7) }
  0x17   : > { %s305_s18 = sld [smem:[#allocation3 + %s2395_s0]] (!%p247_p7) }
  0x18   : > { %s317_s22 = sld [smem:[#allocation3 + %s2395_s0]] (!%p247_p7) }
  0x1a   : > { %p300_p9 = scmp.lt.s32.totalorder (!%p247_p7), %s299_s27, 1 }
  0x1c   : > { %s2778_s28 = smov (!%p294_p8, %s1831_s28), 191  ;;  %s2780_s27 = smov (!%p300_p9, %s299_s27), 1 }
  0x1d   : > { %s1832_s29 = sshll.u32 %s2778_s28, 2  ;;  %s1833_s9 = sshll.u32 %s2780_s27, 1 }
  0x1e   : > { %s2409_s8 = scalar_lea.vmem %s2771_s1, %s1832_s29  ;;  %s303_s12 = scalar_lea.vmem %s2772_s2, %s1833_s9 }
  0x1f   : > { %v2288_v0 = vld [vmem:[%s2409_s8] sm:$0xff]   ;;  %v2289_v3 = vld [vmem:[%s2409_s8 + $0x8] sm:$0xff]   ;;  %v2290_v4 = vld [vmem:[%s2409_s8 + $0x10] sm:$0xff]   ;;  %p311_p10 = scmp.lt.s32.totalorder %s310_s13, 1  ;;  %p306_p11 = scmp.lt.s32.totalorder %s305_s18, 1 }
  0x20   : > { %2118 = vmatprep.mubr.msk.bf16.mxu0 %vm561_vm0, %v2288_v0  ;;  %v393_v1 = vld [vmem:[%s303_s12] sm:$0x3]  ;;  %v2291_v5 = vld [vmem:[%s2409_s8 + $0x18] sm:$0xff]   ;;  %v2293_v7 = vld [vmem:[%s2409_s8 + $0x28] sm:$0xff]   ;;  %p318_p12 = scmp.lt.s32.totalorder %s317_s22, 1  ;;  %s2574_s7 = scalar_lea.vmem %s2776_s6, %s1832_s29 }
  0x21   : > { %2278 = vmatprep.subr.msk.bf16.mxu0 %vm658_vm1, %v393_v1  ;;  %v660_v2 = vsel %vm658_vm1, %v393_v1, 0  ;;  %v2292_v6 = vld [vmem:[%s2409_s8 + $0x20] sm:$0xff]   ;;  %v2294_v8 = vld [vmem:[%s2409_s8 + $0x30] sm:$0xff]   ;;  %s2782_s13 = smov (!%p311_p10, %s310_s13), 1  ;;  %v2295_v9 = vld [vmem:[%s2409_s8 + $0x38] sm:$0xff]   ;;  %s2784_s18 = smov (!%p306_p11, %s305_s18), 1 }
  0x22   : > { %2117 = vmatpush3.bf16.msra.mxu0 %v660_v2  ;;  %s1978_s14 = sshll.u32 %s2782_s13, 6  ;;  %v2296_v10 = vld [vmem:[%s2409_s8 + $0x40] sm:$0xff]   ;;  %v2297_v14 = vld [vmem:[%s2409_s8 + $0x48] sm:$0xff]   ;;  %v2298_v15 = vld [vmem:[%s2409_s8 + $0x50] sm:$0xff]   ;;  %s308_s21 = scalar_lea.vmem %s2773_s3, %s2784_s18 }
  0x23   : > { %s2433_s17 = scalar_lea.vmem %s2774_s4, %s1978_s14  ;;  %v2299_v18 = vld [vmem:[%s2409_s8 + $0x58] sm:$0xff]   ;;  %v2300_v19 = vld [vmem:[%s2409_s8 + $0x60] sm:$0xff]   ;;  %v2301_v21 = vld [vmem:[%s2409_s8 + $0x68] sm:$0xff]   ;;  %s2786_s22 = smov (!%p318_p12, %s317_s22), 1 }
  0x24   : > { %v2320_v11 = vld [vmem:[%s2433_s17] sm:$0xff]   ;;  %v2321_v12 = vld [vmem:[%s2433_s17 + $0x8] sm:$0xff]   ;;  %v2322_v13 = vld [vmem:[%s2433_s17 + $0x10] sm:$0xff]   ;;  %s320_s25 = scalar_lea.vmem %s2775_s5, %s2786_s22 }
  0x25   : > { %2119 = vmatmul.mubr.msk.bf16.vlgmr.msra.gmra.mrb[0].mxu0 %vm561_vm0, %v2289_v3  ;;  %2182 = vmatprep.subr.bf16.mxu0 %v2320_v11  ;;  %v2323_v16 = vld [vmem:[%s2433_s17 + $0x18] sm:$0xff]   ;;  %v2324_v17 = vld [vmem:[%s2433_s17 + $0x20] sm:$0xff]   ;;  %v2325_v20 = vld [vmem:[%s2433_s17 + $0x28] sm:$0xff]  }
  0x26   : > { %2122 = vmatprep.mubr.msk.bf16.mxu0 %vm561_vm0, %v2290_v4  ;;  %2183 = vmatpush3.bf16.msra.mxu0 %v2320_v11  ;;  %v2302_v22 = vld [vmem:[%s2409_s8 + $0x70] sm:$0xff]   ;;  %v2303_v23 = vld [vmem:[%s2409_s8 + $0x78] sm:$0xff]   ;;  %v2304_v24 = vld [vmem:[%s2409_s8 + $0x80] sm:$0xff]  }
  0x27   : > { %2262 = vmatprep.subr.bf16.mxu1 %v2320_v11  ;;  %2184 = vmatprep.subr.bf16.mxu0 %v2321_v12  ;;  %v2305_v25 = vld [vmem:[%s2409_s8 + $0x88] sm:$0xff]   ;;  %v2306_v26 = vld [vmem:[%s2409_s8 + $0x90] sm:$0xff]   ;;  %v2307_v27 = vld [vmem:[%s2409_s8 + $0x98] sm:$0xff]  }
  0x28   : > { %2270 = vmatpush3.bf16.msra.mxu1 %v2320_v11  ;;  %v2308_v28 = vld [vmem:[%s2409_s8 + $0xa0] sm:$0xff]   ;;  %v2309_v29 = vld [vmem:[%s2409_s8 + $0xa8] sm:$0xff]   ;;  %v2310_v30 = vld [vmem:[%s2409_s8 + $0xb0] sm:$0xff]  }
  0x29   : > { %2263 = vmatprep.subr.bf16.mxu1 %v2321_v12  ;;  %v2311_v31 = vld [vmem:[%s2409_s8 + $0xb8] sm:$0xff]   ;;  %v2326_v32 = vld [vmem:[%s2433_s17 + $0x30] sm:$0xff]   ;;  %v2312_v33 = vld [vmem:[%s2409_s8 + $0xc0] sm:$0xff]  }
  0x2a   : > { %2185 = vmatpush3.bf16.msra.mxu0 %v2321_v12  ;;  %v2327_v34 = vld [vmem:[%s2433_s17 + $0x38] sm:$0xff]   ;;  %v2313_v35 = vld [vmem:[%s2409_s8 + $0xc8] sm:$0xff]   ;;  %v2314_v36 = vld [vmem:[%s2409_s8 + $0xd0] sm:$0xff]  }
  0x2b   : > { %2186 = vmatprep.subr.bf16.mxu0 %v2322_v13  ;;  %v2315_v37 = vld [vmem:[%s2409_s8 + $0xd8] sm:$0xff]   ;;  %v2316_v38 = vld [vmem:[%s2409_s8 + $0xe0] sm:$0xff]   ;;  %v2317_v39 = vld [vmem:[%s2409_s8 + $0xe8] sm:$0xff]  }
  0x2c   : > { %2271 = vmatpush3.bf16.msra.mxu1 %v2321_v12  ;;  %v2318_v40 = vld [vmem:[%s2409_s8 + $0xf0] sm:$0xff]   ;;  %v2319_v41 = vld [vmem:[%s2409_s8 + $0xf8] sm:$0xff]   ;;  %v2496_v42 = vld [vmem:[%s308_s21] ss:$0 sm:$0xff] }
  0x2d   : > { %2123 = vmatmul.mubr.msk.bf16.gmra.mrb[4].mxu0 %vm561_vm0, %v2291_v5  ;;  %2264 = vmatprep.subr.bf16.mxu1 %v2322_v13 }
  0x2e   : > { %2126 = vmatprep.mubr.msk.bf16.mxu0 %vm561_vm0, %v2292_v6  ;;  %2187 = vmatpush3.bf16.msra.mxu0 %v2322_v13 }
  0x2f   : > { %2188 = vmatprep.subr.bf16.mxu0 %v2323_v16 }
  0x30   : > { %2272 = vmatpush3.bf16.msra.mxu1 %v2322_v13 }
  0x31   : > { %2265 = vmatprep.subr.bf16.mxu1 %v2323_v16 }
  0x32   : > { %2189 = vmatpush3.bf16.msra.mxu0 %v2323_v16 }
  0x33   : > { %2190 = vmatprep.subr.bf16.mxu0 %v2324_v17 }
  0x34   : > { %2273 = vmatpush3.bf16.msra.mxu1 %v2323_v16 }
  0x35   : > { %2127 = vmatmul.mubr.msk.bf16.gmra.mrb[8].mxu0 %vm561_vm0, %v2293_v7  ;;  %2266 = vmatprep.subr.bf16.mxu1 %v2324_v17 }
  0x36   : > { %2130 = vmatprep.mubr.msk.bf16.mxu0 %vm561_vm0, %v2294_v8  ;;  %2191 = vmatpush3.bf16.msra.mxu0 %v2324_v17 }
  0x37   : > { %2192 = vmatprep.subr.bf16.mxu0 %v2325_v20 }
  0x38   : > { %2274 = vmatpush3.bf16.msra.mxu1 %v2324_v17 }
  0x39   : > { %2267 = vmatprep.subr.bf16.mxu1 %v2325_v20 }
  0x3a   : > { %2193 = vmatpush3.bf16.msra.mxu0 %v2325_v20 }
  0x3b   : > { %2194 = vmatprep.subr.bf16.mxu0 %v2326_v32 }
  0x3c   : > { %2275 = vmatpush3.bf16.msra.mxu1 %v2325_v20 }
  0x3d   : > { %2131 = vmatmul.mubr.msk.bf16.gmra.mrb[12].mxu0 %vm561_vm0, %v2295_v9  ;;  %2268 = vmatprep.subr.bf16.mxu1 %v2326_v32 }
  0x3e   : > { %2134 = vmatprep.mubr.msk.bf16.mxu0 %vm561_vm0, %v2296_v10  ;;  %2195 = vmatpush3.bf16.msra.mxu0 %v2326_v32 }
  0x3f   : > { %2196 = vmatprep.subr.bf16.mxu0 %v2327_v34 }
  0x40   : > { %2276 = vmatpush3.bf16.msra.mxu1 %v2326_v32 }
  0x41   : > { %2269 = vmatprep.subr.bf16.mxu1 %v2327_v34 }
  0x42   : > { %2197 = vmatpush3.bf16.msra.mxu0 %v2327_v34 }
  0x44   : > { %2277 = vmatpush3.bf16.msra.mxu1 %v2327_v34 }
  0x45   : > { %2135 = vmatmul.mubr.msk.bf16.gmra.mrb[16].mxu0 %vm561_vm0, %v2297_v14 }
  0x46   : > { %2138 = vmatprep.mubr.msk.bf16.mxu0 %vm561_vm0, %v2298_v15 }
  0x4d   : > { %2139 = vmatmul.mubr.msk.bf16.gmra.mrb[20].mxu0 %vm561_vm0, %v2299_v18 }
  0x4e   : > { %2142 = vmatprep.mubr.msk.bf16.mxu0 %vm561_vm0, %v2300_v19 }
  0x55   : > { %2143 = vmatmul.mubr.msk.bf16.gmra.mrb[24].mxu0 %vm561_vm0, %v2301_v21 }
  0x56   : > { %2146 = vmatprep.mubr.msk.bf16.mxu0 %vm561_vm0, %v2302_v22 }
  0x5d   : > { %2147 = vmatmul.mubr.msk.bf16.gmra.mrb[28].mxu0 %vm561_vm0, %v2303_v23 }
  0x5e   : > { %2150 = vmatprep.mubr.msk.bf16.mxu0 %vm561_vm0, %v2304_v24 }
  0x65   : > { %2151 = vmatmul.mubr.msk.bf16.gmra.mrb[32].mxu0 %vm561_vm0, %v2305_v25 }
  0x66   : > { %2154 = vmatprep.mubr.msk.bf16.mxu0 %vm561_vm0, %v2306_v26 }
  0x6d   : > { %2155 = vmatmul.mubr.msk.bf16.gmra.mrb[36].mxu0 %vm561_vm0, %v2307_v27 }
  0x6e   : > { %2158 = vmatprep.mubr.msk.bf16.mxu0 %vm561_vm0, %v2308_v28 }
  0x75   : > { %2159 = vmatmul.mubr.msk.bf16.gmra.mrb[40].mxu0 %vm561_vm0, %v2309_v29 }
  0x76   : > { %2162 = vmatprep.mubr.msk.bf16.mxu0 %vm561_vm0, %v2310_v30 }
  0x7d   : > { %2163 = vmatmul.mubr.msk.bf16.gmra.mrb[44].mxu0 %vm561_vm0, %v2311_v31 }
  0x7e   : > { %2166 = vmatprep.mubr.msk.bf16.mxu0 %vm561_vm0, %v2312_v33 }
  0x85   : > { %2167 = vmatmul.mubr.msk.bf16.gmra.mrb[48].mxu0 %vm561_vm0, %v2313_v35 }
  0x86   : > { %2170 = vmatprep.mubr.msk.bf16.mxu0 %vm561_vm0, %v2314_v36 }
  0x8d   : > { %2171 = vmatmul.mubr.msk.bf16.gmra.mrb[52].mxu0 %vm561_vm0, %v2315_v37 }
  0x8e   : > { %2174 = vmatprep.mubr.msk.bf16.mxu0 %vm561_vm0, %v2316_v38 }
  0x95   : > { %2175 = vmatmul.mubr.msk.bf16.gmra.mrb[56].mxu0 %vm561_vm0, %v2317_v39 }
  0x96   : > { %2178 = vmatprep.mubr.msk.bf16.mxu0 %vm561_vm0, %v2318_v40 }
  0x9d   : > { %2179 = vmatmul.mubr.msk.bf16.gmra.mrb[60].mxu0 %vm561_vm0, %v2319_v41 }
  0xf8   : > { %v2120_v43 = vpop.f32.mrb[0].mxu0 }
  0xf9   : > { %v705_v44 = vadd.f32 %v2120_v43, %v2496_v42  ;;  %v696_v45 = vpop.f32.mrb[1].mxu0 }
  0xfa   : > { %v697_v46 = vadd.f32 %v2496_v42, %v696_v45  ;;  %v2121_v47 = vpop.f32.mrb[2].mxu0 }
  0xfb   : > { %v708_v48 = vadd.f32 %v2121_v47, %v2496_v42  ;;  %v699_v49 = vpop.f32.mrb[3].mxu0  ;;  %v953_v51 = vmax.f32 %v705_v44, 0.0 }
  0xfc   : > { %v700_v50 = vadd.f32 %v2496_v42, %v699_v49  ;;  %v951_v53 = vmax.f32 %v697_v46, 0.0 }
  0xfd   : > { %v954_v52 = vmax.f32 %v708_v48, 0.0 }
  0xfe   : > { %v952_v54 = vmax.f32 %v700_v50, 0.0 }
  0xff   : > { %v1016_v55 = vpack.c.bf16 %v954_v52, %v953_v51 }
 0x100   : > { %v1015_v56 = vpack.c.bf16 %v952_v54, %v951_v53  ;;  %v2124_v57 = vpop.f32.mrb[4].mxu0 }
 0x101   : > { %v721_v58 = vadd.f32 %v2124_v57, %v2496_v42  ;;  %v712_v59 = vpop.f32.mrb[5].mxu0 }
 0x102   : > { %v713_v60 = vadd.f32 %v2496_v42, %v712_v59  ;;  %v2125_v61 = vpop.f32.mrb[6].mxu0  ;;  %2198 = vmatprep.mubr.bf16.mxu0 %v1015_v56 }
 0x103   : > { %v724_v62 = vadd.f32 %v2125_v61, %v2496_v42  ;;  %v715_v63 = vpop.f32.mrb[7].mxu0  ;;  %2199 = vmatmul.mubr.bf16.vlgmr.msra.gmra.mrb[64].mxu0 %v1016_v55  ;;  %v957_v1 = vmax.f32 %v721_v58, 0.0 }
 0x104   : > { %v716_v0 = vadd.f32 %v2496_v42, %v715_v63  ;;  %v955_v3 = vmax.f32 %v713_v60, 0.0 }
 0x105   : > { %v958_v2 = vmax.f32 %v724_v62, 0.0 }
 0x106   : > { %v956_v4 = vmax.f32 %v716_v0, 0.0 }
 0x107   : > { %v1018_v5 = vpack.c.bf16 %v958_v2, %v957_v1 }
 0x108   : > { %v2128_v6 = vpop.f32.mrb[8].mxu0  ;;  %v1017_v7 = vpack.c.bf16 %v956_v4, %v955_v3 }
 0x109   : > { %v737_v8 = vadd.f32 %v2128_v6, %v2496_v42  ;;  %v728_v9 = vpop.f32.mrb[9].mxu0 }
 0x10a   : > { %v729_v10 = vadd.f32 %v2496_v42, %v728_v9  ;;  %v2129_v11 = vpop.f32.mrb[10].mxu0  ;;  %2202 = vmatprep.mubr.bf16.mxu1 %v1017_v7 }
 0x10b   : > { %v740_v12 = vadd.f32 %v2129_v11, %v2496_v42  ;;  %v731_v13 = vpop.f32.mrb[11].mxu0  ;;  %2203 = vmatmul.mubr.bf16.vlgmr.msra.gmra.mrb[0].mxu1 %v1018_v5  ;;  %v961_v15 = vmax.f32 %v737_v8, 0.0 }
 0x10c   : > { %v732_v14 = vadd.f32 %v2496_v42, %v731_v13  ;;  %v959_v17 = vmax.f32 %v729_v10, 0.0 }
 0x10d   : > { %v962_v16 = vmax.f32 %v740_v12, 0.0 }
 0x10e   : > { %v960_v18 = vmax.f32 %v732_v14, 0.0 }
 0x10f   : > { %v1020_v19 = vpack.c.bf16 %v962_v16, %v961_v15 }
 0x110   : > { %v1019_v20 = vpack.c.bf16 %v960_v18, %v959_v17  ;;  %v2132_v21 = vpop.f32.mrb[12].mxu0 }
 0x111   : > { %v753_v22 = vadd.f32 %v2132_v21, %v2496_v42  ;;  %v744_v23 = vpop.f32.mrb[13].mxu0 }
 0x112   : > { %v745_v24 = vadd.f32 %v2496_v42, %v744_v23  ;;  %v2133_v25 = vpop.f32.mrb[14].mxu0  ;;  %2206 = vmatprep.mubr.bf16.mxu1 %v1019_v20 }
 0x113   : > { %v756_v26 = vadd.f32 %v2133_v25, %v2496_v42  ;;  %v747_v27 = vpop.f32.mrb[15].mxu0  ;;  %2207 = vmatmul.mubr.bf16.gmra.mrb[4].mxu1 %v1020_v19  ;;  %v965_v29 = vmax.f32 %v753_v22, 0.0 }
 0x114   : > { %v748_v28 = vadd.f32 %v2496_v42, %v747_v27  ;;  %v963_v31 = vmax.f32 %v745_v24, 0.0 }
 0x115   : > { %v966_v30 = vmax.f32 %v756_v26, 0.0 }
 0x116   : > { %v964_v32 = vmax.f32 %v748_v28, 0.0 }
 0x117   : > { %v1022_v33 = vpack.c.bf16 %v966_v30, %v965_v29 }
 0x118   : > { %v1021_v34 = vpack.c.bf16 %v964_v32, %v963_v31  ;;  %v2136_v35 = vpop.f32.mrb[16].mxu0 }
 0x119   : > { %v769_v36 = vadd.f32 %v2136_v35, %v2496_v42  ;;  %v760_v37 = vpop.f32.mrb[17].mxu0 }
 0x11a   : > { %v761_v38 = vadd.f32 %v2496_v42, %v760_v37  ;;  %v2137_v39 = vpop.f32.mrb[18].mxu0  ;;  %2210 = vmatprep.mubr.bf16.mxu1 %v1021_v34 }
 0x11b   : > { %v772_v40 = vadd.f32 %v2137_v39, %v2496_v42  ;;  %v763_v41 = vpop.f32.mrb[19].mxu0  ;;  %2211 = vmatmul.mubr.bf16.gmra.mrb[8].mxu1 %v1022_v33  ;;  %v969_v44 = vmax.f32 %v769_v36, 0.0 }
 0x11c   : > { %v764_v43 = vadd.f32 %v2496_v42, %v763_v41  ;;  %v967_v46 = vmax.f32 %v761_v38, 0.0 }
 0x11d   : > { %v970_v45 = vmax.f32 %v772_v40, 0.0 }
 0x11e   : > { %v968_v47 = vmax.f32 %v764_v43, 0.0 }
 0x11f   : > { %v1024_v48 = vpack.c.bf16 %v970_v45, %v969_v44 }
 0x120   : > { %v1023_v49 = vpack.c.bf16 %v968_v47, %v967_v46  ;;  %v2140_v50 = vpop.f32.mrb[20].mxu0 }
 0x121   : > { %v785_v51 = vadd.f32 %v2140_v50, %v2496_v42  ;;  %v776_v52 = vpop.f32.mrb[21].mxu0 }
 0x122   : > { %v777_v53 = vadd.f32 %v2496_v42, %v776_v52  ;;  %v2141_v54 = vpop.f32.mrb[22].mxu0  ;;  %2214 = vmatprep.mubr.bf16.mxu1 %v1023_v49 }
 0x123   : > { %v788_v55 = vadd.f32 %v2141_v54, %v2496_v42  ;;  %v779_v56 = vpop.f32.mrb[23].mxu0  ;;  %2215 = vmatmul.mubr.bf16.gmra.mrb[12].mxu1 %v1024_v48  ;;  %v973_v58 = vmax.f32 %v785_v51, 0.0 }
 0x124   : > { %v780_v57 = vadd.f32 %v2496_v42, %v779_v56  ;;  %v971_v60 = vmax.f32 %v777_v53, 0.0 }
 0x125   : > { %v974_v59 = vmax.f32 %v788_v55, 0.0 }
 0x126   : > { %v972_v61 = vmax.f32 %v780_v57, 0.0 }
 0x127   : > { %v1026_v62 = vpack.c.bf16 %v974_v59, %v973_v58 }
 0x128   : > { %v1025_v63 = vpack.c.bf16 %v972_v61, %v971_v60  ;;  %v2144_v0 = vpop.f32.mrb[24].mxu0 }
 0x129   : > { %v801_v1 = vadd.f32 %v2144_v0, %v2496_v42  ;;  %v792_v2 = vpop.f32.mrb[25].mxu0 }
 0x12a   : > { %v793_v3 = vadd.f32 %v2496_v42, %v792_v2  ;;  %v2145_v4 = vpop.f32.mrb[26].mxu0  ;;  %2218 = vmatprep.mubr.bf16.mxu1 %v1025_v63 }
 0x12b   : > { %v804_v5 = vadd.f32 %v2145_v4, %v2496_v42  ;;  %v795_v6 = vpop.f32.mrb[27].mxu0  ;;  %2219 = vmatmul.mubr.bf16.gmra.mrb[16].mxu1 %v1026_v62  ;;  %v977_v8 = vmax.f32 %v801_v1, 0.0 }
 0x12c   : > { %v796_v7 = vadd.f32 %v2496_v42, %v795_v6  ;;  %v975_v10 = vmax.f32 %v793_v3, 0.0 }
 0x12d   : > { %v978_v9 = vmax.f32 %v804_v5, 0.0 }
 0x12e   : > { %v976_v11 = vmax.f32 %v796_v7, 0.0 }
 0x12f   : > { %v1028_v12 = vpack.c.bf16 %v978_v9, %v977_v8 }
 0x130   : > { %v1027_v13 = vpack.c.bf16 %v976_v11, %v975_v10  ;;  %v2148_v14 = vpop.f32.mrb[28].mxu0 }
 0x131   : > { %v817_v15 = vadd.f32 %v2148_v14, %v2496_v42  ;;  %v808_v16 = vpop.f32.mrb[29].mxu0 }
 0x132   : > { %v809_v17 = vadd.f32 %v2496_v42, %v808_v16  ;;  %v2149_v18 = vpop.f32.mrb[30].mxu0  ;;  %2222 = vmatprep.mubr.bf16.mxu1 %v1027_v13 }
 0x133   : > { %v820_v19 = vadd.f32 %v2149_v18, %v2496_v42  ;;  %v811_v20 = vpop.f32.mrb[31].mxu0  ;;  %2223 = vmatmul.mubr.bf16.gmra.mrb[20].mxu1 %v1028_v12  ;;  %v981_v22 = vmax.f32 %v817_v15, 0.0 }
 0x134   : > { %v812_v21 = vadd.f32 %v2496_v42, %v811_v20  ;;  %v979_v24 = vmax.f32 %v809_v17, 0.0 }
 0x135   : > { %v982_v23 = vmax.f32 %v820_v19, 0.0 }
 0x136   : > { %v980_v25 = vmax.f32 %v812_v21, 0.0 }
 0x137   : > { %v1030_v26 = vpack.c.bf16 %v982_v23, %v981_v22 }
 0x138   : > { %v1029_v27 = vpack.c.bf16 %v980_v25, %v979_v24  ;;  %v2152_v28 = vpop.f32.mrb[32].mxu0 }
 0x139   : > { %v833_v29 = vadd.f32 %v2152_v28, %v2496_v42  ;;  %v824_v30 = vpop.f32.mrb[33].mxu0 }
 0x13a   : > { %v825_v31 = vadd.f32 %v2496_v42, %v824_v30  ;;  %v2153_v32 = vpop.f32.mrb[34].mxu0  ;;  %2226 = vmatprep.mubr.bf16.mxu1 %v1029_v27 }
 0x13b   : > { %v836_v33 = vadd.f32 %v2153_v32, %v2496_v42  ;;  %v827_v34 = vpop.f32.mrb[35].mxu0  ;;  %2227 = vmatmul.mubr.bf16.gmra.mrb[24].mxu1 %v1030_v26  ;;  %v985_v36 = vmax.f32 %v833_v29, 0.0 }
 0x13c   : > { %v828_v35 = vadd.f32 %v2496_v42, %v827_v34  ;;  %v983_v38 = vmax.f32 %v825_v31, 0.0 }
 0x13d   : > { %v986_v37 = vmax.f32 %v836_v33, 0.0 }
 0x13e   : > { %v984_v39 = vmax.f32 %v828_v35, 0.0 }
 0x13f   : > { %v1032_v40 = vpack.c.bf16 %v986_v37, %v985_v36 }
 0x140   : > { %v1031_v41 = vpack.c.bf16 %v984_v39, %v983_v38  ;;  %v2156_v43 = vpop.f32.mrb[36].mxu0 }
 0x141   : > { %v849_v44 = vadd.f32 %v2156_v43, %v2496_v42  ;;  %v840_v45 = vpop.f32.mrb[37].mxu0 }
 0x142   : > { %v841_v46 = vadd.f32 %v2496_v42, %v840_v45  ;;  %v2157_v47 = vpop.f32.mrb[38].mxu0  ;;  %2230 = vmatprep.mubr.bf16.mxu1 %v1031_v41 }
 0x143   : > { %v852_v48 = vadd.f32 %v2157_v47, %v2496_v42  ;;  %v843_v49 = vpop.f32.mrb[39].mxu0  ;;  %2231 = vmatmul.mubr.bf16.gmra.mrb[28].mxu1 %v1032_v40  ;;  %v989_v51 = vmax.f32 %v849_v44, 0.0 }
 0x144   : > { %v844_v50 = vadd.f32 %v2496_v42, %v843_v49  ;;  %v987_v53 = vmax.f32 %v841_v46, 0.0 }
 0x145   : > { %v990_v52 = vmax.f32 %v852_v48, 0.0 }
 0x146   : > { %v988_v54 = vmax.f32 %v844_v50, 0.0 }
 0x147   : > { %v1034_v55 = vpack.c.bf16 %v990_v52, %v989_v51 }
 0x148   : > { %v1033_v56 = vpack.c.bf16 %v988_v54, %v987_v53  ;;  %v2160_v57 = vpop.f32.mrb[40].mxu0 }
 0x149   : > { %v865_v58 = vadd.f32 %v2160_v57, %v2496_v42  ;;  %v856_v59 = vpop.f32.mrb[41].mxu0 }
 0x14a   : > { %v857_v60 = vadd.f32 %v2496_v42, %v856_v59  ;;  %v2161_v61 = vpop.f32.mrb[42].mxu0  ;;  %2234 = vmatprep.mubr.bf16.mxu1 %v1033_v56 }
 0x14b   : > { %v868_v62 = vadd.f32 %v2161_v61, %v2496_v42  ;;  %v859_v63 = vpop.f32.mrb[43].mxu0  ;;  %2235 = vmatmul.mubr.bf16.gmra.mrb[32].mxu1 %v1034_v55  ;;  %v993_v1 = vmax.f32 %v865_v58, 0.0 }
 0x14c   : > { %v860_v0 = vadd.f32 %v2496_v42, %v859_v63  ;;  %v991_v3 = vmax.f32 %v857_v60, 0.0 }
 0x14d   : > { %v994_v2 = vmax.f32 %v868_v62, 0.0 }
 0x14e   : > { %v992_v4 = vmax.f32 %v860_v0, 0.0 }
 0x14f   : > { %v1036_v5 = vpack.c.bf16 %v994_v2, %v993_v1 }
 0x150   : > { %v1035_v6 = vpack.c.bf16 %v992_v4, %v991_v3  ;;  %v2164_v7 = vpop.f32.mrb[44].mxu0 }
 0x151   : > { %v881_v8 = vadd.f32 %v2164_v7, %v2496_v42  ;;  %v872_v9 = vpop.f32.mrb[45].mxu0 }
 0x152   : > { %v873_v10 = vadd.f32 %v2496_v42, %v872_v9  ;;  %v2165_v11 = vpop.f32.mrb[46].mxu0  ;;  %2238 = vmatprep.mubr.bf16.mxu1 %v1035_v6 }
 0x153   : > { %v884_v12 = vadd.f32 %v2165_v11, %v2496_v42  ;;  %v875_v13 = vpop.f32.mrb[47].mxu0  ;;  %2239 = vmatmul.mubr.bf16.gmra.mrb[36].mxu1 %v1036_v5  ;;  %v997_v15 = vmax.f32 %v881_v8, 0.0 }
 0x154   : > { %v876_v14 = vadd.f32 %v2496_v42, %v875_v13  ;;  %v995_v17 = vmax.f32 %v873_v10, 0.0 }
 0x155   : > { %v998_v16 = vmax.f32 %v884_v12, 0.0 }
 0x156   : > { %v996_v18 = vmax.f32 %v876_v14, 0.0  ;;  %v2566_v14 = vld [vmem:[%s320_s25] ss:$0 sm:$0xff] }
 0x157   : > { %v1038_v19 = vpack.c.bf16 %v998_v16, %v997_v15 }
 0x158   : > { %v1037_v20 = vpack.c.bf16 %v996_v18, %v995_v17  ;;  %v2168_v21 = vpop.f32.mrb[48].mxu0 }
 0x159   : > { %v897_v22 = vadd.f32 %v2168_v21, %v2496_v42  ;;  %v888_v23 = vpop.f32.mrb[49].mxu0 }
 0x15a   : > { %v889_v24 = vadd.f32 %v2496_v42, %v888_v23  ;;  %v2169_v25 = vpop.f32.mrb[50].mxu0  ;;  %2242 = vmatprep.mubr.bf16.mxu1 %v1037_v20 }
 0x15b   : > { %v900_v26 = vadd.f32 %v2169_v25, %v2496_v42  ;;  %v891_v27 = vpop.f32.mrb[51].mxu0  ;;  %2243 = vmatmul.mubr.bf16.gmra.mrb[40].mxu1 %v1038_v19  ;;  %v1001_v29 = vmax.f32 %v897_v22, 0.0 }
 0x15c   : > { %v892_v28 = vadd.f32 %v2496_v42, %v891_v27  ;;  %v999_v31 = vmax.f32 %v889_v24, 0.0 }
 0x15d   : > { %v1002_v30 = vmax.f32 %v900_v26, 0.0 }
 0x15e   : > { %v1000_v32 = vmax.f32 %v892_v28, 0.0 }
 0x15f   : > { %v1040_v33 = vpack.c.bf16 %v1002_v30, %v1001_v29 }
 0x160   : > { %v1039_v34 = vpack.c.bf16 %v1000_v32, %v999_v31  ;;  %v2172_v35 = vpop.f32.mrb[52].mxu0 }
 0x161   : > { %v913_v36 = vadd.f32 %v2172_v35, %v2496_v42  ;;  %v904_v37 = vpop.f32.mrb[53].mxu0 }
 0x162   : > { %v905_v38 = vadd.f32 %v2496_v42, %v904_v37  ;;  %v2173_v39 = vpop.f32.mrb[54].mxu0  ;;  %2246 = vmatprep.mubr.bf16.mxu1 %v1039_v34 }
 0x163   : > { %v916_v40 = vadd.f32 %v2173_v39, %v2496_v42  ;;  %v907_v41 = vpop.f32.mrb[55].mxu0  ;;  %2247 = vmatmul.mubr.bf16.gmra.mrb[44].mxu1 %v1040_v33  ;;  %v1005_v44 = vmax.f32 %v913_v36, 0.0 }
 0x164   : > { %v908_v43 = vadd.f32 %v2496_v42, %v907_v41  ;;  %v1003_v46 = vmax.f32 %v905_v38, 0.0 }
 0x165   : > { %v1006_v45 = vmax.f32 %v916_v40, 0.0 }
 0x166   : > { %v1004_v47 = vmax.f32 %v908_v43, 0.0 }
 0x167   : > { %v1042_v48 = vpack.c.bf16 %v1006_v45, %v1005_v44 }
 0x168   : > { %v1041_v49 = vpack.c.bf16 %v1004_v47, %v1003_v46  ;;  %v2176_v50 = vpop.f32.mrb[56].mxu0 }
 0x169   : > { %v929_v51 = vadd.f32 %v2176_v50, %v2496_v42  ;;  %v920_v52 = vpop.f32.mrb[57].mxu0 }
 0x16a   : > { %v921_v53 = vadd.f32 %v2496_v42, %v920_v52  ;;  %v2177_v54 = vpop.f32.mrb[58].mxu0  ;;  %2250 = vmatprep.mubr.bf16.mxu1 %v1041_v49 }
 0x16b   : > { %v932_v55 = vadd.f32 %v2177_v54, %v2496_v42  ;;  %v923_v56 = vpop.f32.mrb[59].mxu0  ;;  %2251 = vmatmul.mubr.bf16.gmra.mrb[48].mxu1 %v1042_v48  ;;  %v1009_v58 = vmax.f32 %v929_v51, 0.0 }
 0x16c   : > { %v924_v57 = vadd.f32 %v2496_v42, %v923_v56  ;;  %v1007_v60 = vmax.f32 %v921_v53, 0.0 }
 0x16d   : > { %v1010_v59 = vmax.f32 %v932_v55, 0.0 }
 0x16e   : > { %v1008_v61 = vmax.f32 %v924_v57, 0.0 }
 0x16f   : > { %v1044_v62 = vpack.c.bf16 %v1010_v59, %v1009_v58 }
 0x170   : > { %v1043_v63 = vpack.c.bf16 %v1008_v61, %v1007_v60  ;;  %v2180_v0 = vpop.f32.mrb[60].mxu0 }
 0x171   : > { %v945_v1 = vadd.f32 %v2180_v0, %v2496_v42  ;;  %v936_v2 = vpop.f32.mrb[61].mxu0 }
 0x172   : > { %v937_v3 = vadd.f32 %v2496_v42, %v936_v2  ;;  %v2181_v4 = vpop.f32.mrb[62].mxu0  ;;  %2254 = vmatprep.mubr.bf16.mxu1 %v1043_v63 }
 0x173   : > { %v948_v5 = vadd.f32 %v2181_v4, %v2496_v42  ;;  %v939_v6 = vpop.f32.mrb[63].mxu0  ;;  %2255 = vmatmul.mubr.bf16.gmra.mrb[52].mxu1 %v1044_v62  ;;  %v1013_v8 = vmax.f32 %v945_v1, 0.0 }
 0x174   : > { %v940_v7 = vadd.f32 %v2496_v42, %v939_v6  ;;  %v1011_v10 = vmax.f32 %v937_v3, 0.0 }
 0x175   : > { %v1014_v9 = vmax.f32 %v948_v5, 0.0 }
 0x176   : > { %v1012_v11 = vmax.f32 %v940_v7, 0.0 }
 0x177   : > { %v1046_v12 = vpack.c.bf16 %v1014_v9, %v1013_v8 }
 0x178   : > { %v1045_v13 = vpack.c.bf16 %v1012_v11, %v1011_v10 }
 0x17a   : > { %2258 = vmatprep.mubr.bf16.mxu1 %v1045_v13 }
 0x17b   : > { %2259 = vmatmul.mubr.bf16.gmra.mrb[56].mxu1 %v1046_v12 }
 0x1d6   : > { %v2200_v15 = vpop.f32.mrb[64].mxu0 }
 0x1d7   : > { %v1161_v42 = vadd.f32 %v2200_v15, %v2566_v14  ;;  %v1152_v16 = vpop.f32.mrb[65].mxu0 }
 0x1d8   : > { %v1153_v17 = vadd.f32 %v2566_v14, %v1152_v16  ;;  %v2201_v18 = vpop.f32.mrb[66].mxu0 }
 0x1d9   : > { %v1981_v19 = vpack.c.bf16 %v1161_v42, %v1161_v42  ;;  %v1164_v20 = vadd.f32 %v2201_v18, %v2566_v14  ;;  %v1155_v21 = vpop.f32.mrb[67].mxu0 }
 0x1da   : > { %v1979_v22 = vpack.c.bf16 %v1153_v17, %v1153_v17  ;;  %v1156_v23 = vadd.f32 %v2566_v14, %v1155_v21 }
 0x1db   : > { %1666 = vst.msk [vmem:[%s2574_s7 + $0x8] sm:$0xf] %vm1663_vm2, %v1981_v19  ;;  %v1982_v24 = vpack.c.bf16 %v1164_v20, %v1164_v20 }
 0x1dc   : > { %1664 = vst.msk [vmem:[%s2574_s7] sm:$0xf] %vm1663_vm2, %v1979_v22  ;;  %v1980_v25 = vpack.c.bf16 %v1156_v23, %v1156_v23 }
 0x1dd   : > { %1667 = vst.msk [vmem:[%s2574_s7 + $0xc] sm:$0xf] %vm1663_vm2, %v1982_v24 }
 0x1de   : > { %1665 = vst.msk [vmem:[%s2574_s7 + $0x4] sm:$0xf] %vm1663_vm2, %v1980_v25  ;;  %v2204_v26 = vpop.f32.mrb[0].mxu1 }
 0x1df   : > { %v1177_v27 = vadd.f32 %v2204_v26, %v2566_v14  ;;  %v1168_v28 = vpop.f32.mrb[1].mxu1 }
 0x1e0   : > { %v1169_v29 = vadd.f32 %v2566_v14, %v1168_v28  ;;  %v2205_v30 = vpop.f32.mrb[2].mxu1 }
 0x1e1   : > { %v1985_v31 = vpack.c.bf16 %v1177_v27, %v1177_v27  ;;  %v1180_v32 = vadd.f32 %v2205_v30, %v2566_v14  ;;  %v1171_v33 = vpop.f32.mrb[3].mxu1 }
 0x1e2   : > { %v1983_v34 = vpack.c.bf16 %v1169_v29, %v1169_v29  ;;  %v1172_v35 = vadd.f32 %v2566_v14, %v1171_v33 }
 0x1e3   : > { %1670 = vst.msk [vmem:[%s2574_s7 + $0x18] sm:$0xf] %vm1663_vm2, %v1985_v31  ;;  %v1986_v36 = vpack.c.bf16 %v1180_v32, %v1180_v32 }
 0x1e4   : > { %1668 = vst.msk [vmem:[%s2574_s7 + $0x10] sm:$0xf] %vm1663_vm2, %v1983_v34  ;;  %v1984_v37 = vpack.c.bf16 %v1172_v35, %v1172_v35 }
 0x1e5   : > { %1671 = vst.msk [vmem:[%s2574_s7 + $0x1c] sm:$0xf] %vm1663_vm2, %v1986_v36 }
 0x1e6   : > { %1669 = vst.msk [vmem:[%s2574_s7 + $0x14] sm:$0xf] %vm1663_vm2, %v1984_v37  ;;  %v2208_v38 = vpop.f32.mrb[4].mxu1 }
 0x1e7   : > { %v1193_v39 = vadd.f32 %v2208_v38, %v2566_v14  ;;  %v1184_v40 = vpop.f32.mrb[5].mxu1 }
 0x1e8   : > { %v1185_v41 = vadd.f32 %v2566_v14, %v1184_v40  ;;  %v2209_v43 = vpop.f32.mrb[6].mxu1 }
 0x1e9   : > { %v1989_v44 = vpack.c.bf16 %v1193_v39, %v1193_v39  ;;  %v1196_v45 = vadd.f32 %v2209_v43, %v2566_v14  ;;  %v1187_v46 = vpop.f32.mrb[7].mxu1 }
 0x1ea   : > { %v1987_v47 = vpack.c.bf16 %v1185_v41, %v1185_v41  ;;  %v1188_v48 = vadd.f32 %v2566_v14, %v1187_v46 }
 0x1eb   : > { %1674 = vst.msk [vmem:[%s2574_s7 + $0x28] sm:$0xf] %vm1663_vm2, %v1989_v44  ;;  %v1990_v49 = vpack.c.bf16 %v1196_v45, %v1196_v45 }
 0x1ec   : > { %1672 = vst.msk [vmem:[%s2574_s7 + $0x20] sm:$0xf] %vm1663_vm2, %v1987_v47  ;;  %v1988_v50 = vpack.c.bf16 %v1188_v48, %v1188_v48 }
 0x1ed   : > { %1675 = vst.msk [vmem:[%s2574_s7 + $0x2c] sm:$0xf] %vm1663_vm2, %v1990_v49 }
 0x1ee   : > { %1673 = vst.msk [vmem:[%s2574_s7 + $0x24] sm:$0xf] %vm1663_vm2, %v1988_v50  ;;  %v2212_v51 = vpop.f32.mrb[8].mxu1 }
 0x1ef   : > { %v1209_v52 = vadd.f32 %v2212_v51, %v2566_v14  ;;  %v1200_v53 = vpop.f32.mrb[9].mxu1 }
 0x1f0   : > { %v1201_v54 = vadd.f32 %v2566_v14, %v1200_v53  ;;  %v2213_v55 = vpop.f32.mrb[10].mxu1 }
 0x1f1   : > { %v1993_v56 = vpack.c.bf16 %v1209_v52, %v1209_v52  ;;  %v1212_v57 = vadd.f32 %v2213_v55, %v2566_v14  ;;  %v1203_v58 = vpop.f32.mrb[11].mxu1 }
 0x1f2   : > { %v1991_v59 = vpack.c.bf16 %v1201_v54, %v1201_v54  ;;  %v1204_v60 = vadd.f32 %v2566_v14, %v1203_v58 }
 0x1f3   : > { %1678 = vst.msk [vmem:[%s2574_s7 + $0x38] sm:$0xf] %vm1663_vm2, %v1993_v56  ;;  %v1994_v61 = vpack.c.bf16 %v1212_v57, %v1212_v57 }
 0x1f4   : > { %1676 = vst.msk [vmem:[%s2574_s7 + $0x30] sm:$0xf] %vm1663_vm2, %v1991_v59  ;;  %v1992_v62 = vpack.c.bf16 %v1204_v60, %v1204_v60 }
 0x1f5   : > { %1679 = vst.msk [vmem:[%s2574_s7 + $0x3c] sm:$0xf] %vm1663_vm2, %v1994_v61 }
 0x1f6   : > { %1677 = vst.msk [vmem:[%s2574_s7 + $0x34] sm:$0xf] %vm1663_vm2, %v1992_v62  ;;  %v2216_v63 = vpop.f32.mrb[12].mxu1 }
 0x1f7   : > { %v1225_v0 = vadd.f32 %v2216_v63, %v2566_v14  ;;  %v1216_v1 = vpop.f32.mrb[13].mxu1 }
 0x1f8   : > { %v1217_v2 = vadd.f32 %v2566_v14, %v1216_v1  ;;  %v2217_v3 = vpop.f32.mrb[14].mxu1 }
 0x1f9   : > { %v1997_v4 = vpack.c.bf16 %v1225_v0, %v1225_v0  ;;  %v1228_v5 = vadd.f32 %v2217_v3, %v2566_v14  ;;  %v1219_v6 = vpop.f32.mrb[15].mxu1 }
 0x1fa   : > { %v1995_v7 = vpack.c.bf16 %v1217_v2, %v1217_v2  ;;  %v1220_v8 = vadd.f32 %v2566_v14, %v1219_v6 }
 0x1fb   : > { %1682 = vst.msk [vmem:[%s2574_s7 + $0x48] sm:$0xf] %vm1663_vm2, %v1997_v4  ;;  %v1998_v9 = vpack.c.bf16 %v1228_v5, %v1228_v5 }
 0x1fc   : > { %1680 = vst.msk [vmem:[%s2574_s7 + $0x40] sm:$0xf] %vm1663_vm2, %v1995_v7  ;;  %v1996_v10 = vpack.c.bf16 %v1220_v8, %v1220_v8 }
 0x1fd   : > { %1683 = vst.msk [vmem:[%s2574_s7 + $0x4c] sm:$0xf] %vm1663_vm2, %v1998_v9 }
 0x1fe   : > { %1681 = vst.msk [vmem:[%s2574_s7 + $0x44] sm:$0xf] %vm1663_vm2, %v1996_v10  ;;  %v2220_v11 = vpop.f32.mrb[16].mxu1 }
 0x1ff   : > { %v1241_v12 = vadd.f32 %v2220_v11, %v2566_v14  ;;  %v1232_v13 = vpop.f32.mrb[17].mxu1 }
 0x200   : > { %v1233_v15 = vadd.f32 %v2566_v14, %v1232_v13  ;;  %v2221_v42 = vpop.f32.mrb[18].mxu1 }
 0x201   : > { %v2001_v16 = vpack.c.bf16 %v1241_v12, %v1241_v12  ;;  %v1244_v17 = vadd.f32 %v2221_v42, %v2566_v14  ;;  %v1235_v18 = vpop.f32.mrb[19].mxu1 }
 0x202   : > { %v1999_v19 = vpack.c.bf16 %v1233_v15, %v1233_v15  ;;  %v1236_v20 = vadd.f32 %v2566_v14, %v1235_v18 }
 0x203   : > { %1686 = vst.msk [vmem:[%s2574_s7 + $0x58] sm:$0xf] %vm1663_vm2, %v2001_v16  ;;  %v2002_v21 = vpack.c.bf16 %v1244_v17, %v1244_v17 }
 0x204   : > { %1684 = vst.msk [vmem:[%s2574_s7 + $0x50] sm:$0xf] %vm1663_vm2, %v1999_v19  ;;  %v2000_v22 = vpack.c.bf16 %v1236_v20, %v1236_v20 }
 0x205   : > { %1687 = vst.msk [vmem:[%s2574_s7 + $0x5c] sm:$0xf] %vm1663_vm2, %v2002_v21 }
 0x206   : > { %1685 = vst.msk [vmem:[%s2574_s7 + $0x54] sm:$0xf] %vm1663_vm2, %v2000_v22  ;;  %v2224_v23 = vpop.f32.mrb[20].mxu1 }
 0x207   : > { %v1257_v24 = vadd.f32 %v2224_v23, %v2566_v14  ;;  %v1248_v25 = vpop.f32.mrb[21].mxu1 }
 0x208   : > { %v1249_v26 = vadd.f32 %v2566_v14, %v1248_v25  ;;  %v2225_v27 = vpop.f32.mrb[22].mxu1 }
 0x209   : > { %v2005_v28 = vpack.c.bf16 %v1257_v24, %v1257_v24  ;;  %v1260_v29 = vadd.f32 %v2225_v27, %v2566_v14  ;;  %v1251_v30 = vpop.f32.mrb[23].mxu1 }
 0x20a   : > { %v2003_v31 = vpack.c.bf16 %v1249_v26, %v1249_v26  ;;  %v1252_v32 = vadd.f32 %v2566_v14, %v1251_v30 }
 0x20b   : > { %1690 = vst.msk [vmem:[%s2574_s7 + $0x68] sm:$0xf] %vm1663_vm2, %v2005_v28  ;;  %v2006_v33 = vpack.c.bf16 %v1260_v29, %v1260_v29 }
 0x20c   : > { %1688 = vst.msk [vmem:[%s2574_s7 + $0x60] sm:$0xf] %vm1663_vm2, %v2003_v31  ;;  %v2004_v34 = vpack.c.bf16 %v1252_v32, %v1252_v32 }
 0x20d   : > { %1691 = vst.msk [vmem:[%s2574_s7 + $0x6c] sm:$0xf] %vm1663_vm2, %v2006_v33 }
 0x20e   : > { %1689 = vst.msk [vmem:[%s2574_s7 + $0x64] sm:$0xf] %vm1663_vm2, %v2004_v34  ;;  %v2228_v35 = vpop.f32.mrb[24].mxu1 }
 0x20f   : > { %v1273_v36 = vadd.f32 %v2228_v35, %v2566_v14  ;;  %v1264_v37 = vpop.f32.mrb[25].mxu1 }
 0x210   : > { %v1265_v38 = vadd.f32 %v2566_v14, %v1264_v37  ;;  %v2229_v39 = vpop.f32.mrb[26].mxu1 }
 0x211   : > { %v2009_v40 = vpack.c.bf16 %v1273_v36, %v1273_v36  ;;  %v1276_v41 = vadd.f32 %v2229_v39, %v2566_v14  ;;  %v1267_v43 = vpop.f32.mrb[27].mxu1 }
 0x212   : > { %v2007_v44 = vpack.c.bf16 %v1265_v38, %v1265_v38  ;;  %v1268_v45 = vadd.f32 %v2566_v14, %v1267_v43 }
 0x213   : > { %1694 = vst.msk [vmem:[%s2574_s7 + $0x78] sm:$0xf] %vm1663_vm2, %v2009_v40  ;;  %v2010_v46 = vpack.c.bf16 %v1276_v41, %v1276_v41 }
 0x214   : > { %1692 = vst.msk [vmem:[%s2574_s7 + $0x70] sm:$0xf] %vm1663_vm2, %v2007_v44  ;;  %v2008_v47 = vpack.c.bf16 %v1268_v45, %v1268_v45 }
 0x215   : > { %1695 = vst.msk [vmem:[%s2574_s7 + $0x7c] sm:$0xf] %vm1663_vm2, %v2010_v46 }
 0x216   : > { %1693 = vst.msk [vmem:[%s2574_s7 + $0x74] sm:$0xf] %vm1663_vm2, %v2008_v47  ;;  %v2232_v48 = vpop.f32.mrb[28].mxu1 }
 0x217   : > { %v1289_v49 = vadd.f32 %v2232_v48, %v2566_v14  ;;  %v1280_v50 = vpop.f32.mrb[29].mxu1 }
 0x218   : > { %v1281_v51 = vadd.f32 %v2566_v14, %v1280_v50  ;;  %v2233_v52 = vpop.f32.mrb[30].mxu1 }
 0x219   : > { %v2013_v53 = vpack.c.bf16 %v1289_v49, %v1289_v49  ;;  %v1292_v54 = vadd.f32 %v2233_v52, %v2566_v14  ;;  %v1283_v55 = vpop.f32.mrb[31].mxu1 }
 0x21a   : > { %v2011_v56 = vpack.c.bf16 %v1281_v51, %v1281_v51  ;;  %v1284_v57 = vadd.f32 %v2566_v14, %v1283_v55 }
 0x21b   : > { %1698 = vst.msk [vmem:[%s2574_s7 + $0x88] sm:$0xf] %vm1663_vm2, %v2013_v53  ;;  %v2014_v58 = vpack.c.bf16 %v1292_v54, %v1292_v54 }
 0x21c   : > { %1696 = vst.msk [vmem:[%s2574_s7 + $0x80] sm:$0xf] %vm1663_vm2, %v2011_v56  ;;  %v2012_v59 = vpack.c.bf16 %v1284_v57, %v1284_v57 }
 0x21d   : > { %1699 = vst.msk [vmem:[%s2574_s7 + $0x8c] sm:$0xf] %vm1663_vm2, %v2014_v58 }
 0x21e   : > { %1697 = vst.msk [vmem:[%s2574_s7 + $0x84] sm:$0xf] %vm1663_vm2, %v2012_v59  ;;  %v2236_v60 = vpop.f32.mrb[32].mxu1 }
 0x21f   : > { %v1305_v61 = vadd.f32 %v2236_v60, %v2566_v14  ;;  %v1296_v62 = vpop.f32.mrb[33].mxu1 }
 0x220   : > { %v1297_v63 = vadd.f32 %v2566_v14, %v1296_v62  ;;  %v2237_v0 = vpop.f32.mrb[34].mxu1 }
 0x221   : > { %v2017_v1 = vpack.c.bf16 %v1305_v61, %v1305_v61  ;;  %v1308_v2 = vadd.f32 %v2237_v0, %v2566_v14  ;;  %v1299_v3 = vpop.f32.mrb[35].mxu1 }
 0x222   : > { %v2015_v4 = vpack.c.bf16 %v1297_v63, %v1297_v63  ;;  %v1300_v5 = vadd.f32 %v2566_v14, %v1299_v3 }
 0x223   : > { %1702 = vst.msk [vmem:[%s2574_s7 + $0x98] sm:$0xf] %vm1663_vm2, %v2017_v1  ;;  %v2018_v6 = vpack.c.bf16 %v1308_v2, %v1308_v2 }
 0x224   : > { %1700 = vst.msk [vmem:[%s2574_s7 + $0x90] sm:$0xf] %vm1663_vm2, %v2015_v4  ;;  %v2016_v7 = vpack.c.bf16 %v1300_v5, %v1300_v5 }
 0x225   : > { %1703 = vst.msk [vmem:[%s2574_s7 + $0x9c] sm:$0xf] %vm1663_vm2, %v2018_v6 }
 0x226   : > { %1701 = vst.msk [vmem:[%s2574_s7 + $0x94] sm:$0xf] %vm1663_vm2, %v2016_v7  ;;  %v2240_v8 = vpop.f32.mrb[36].mxu1 }
 0x227   : > { %v1321_v9 = vadd.f32 %v2240_v8, %v2566_v14  ;;  %v1312_v10 = vpop.f32.mrb[37].mxu1 }
 0x228   : > { %v1313_v11 = vadd.f32 %v2566_v14, %v1312_v10  ;;  %v2241_v12 = vpop.f32.mrb[38].mxu1 }
 0x229   : > { %v2021_v13 = vpack.c.bf16 %v1321_v9, %v1321_v9  ;;  %v1324_v15 = vadd.f32 %v2241_v12, %v2566_v14  ;;  %v1315_v42 = vpop.f32.mrb[39].mxu1 }
 0x22a   : > { %v2019_v16 = vpack.c.bf16 %v1313_v11, %v1313_v11  ;;  %v1316_v17 = vadd.f32 %v2566_v14, %v1315_v42 }
 0x22b   : > { %1706 = vst.msk [vmem:[%s2574_s7 + $0xa8] sm:$0xf] %vm1663_vm2, %v2021_v13  ;;  %v2022_v18 = vpack.c.bf16 %v1324_v15, %v1324_v15 }
 0x22c   : > { %1704 = vst.msk [vmem:[%s2574_s7 + $0xa0] sm:$0xf] %vm1663_vm2, %v2019_v16  ;;  %v2020_v19 = vpack.c.bf16 %v1316_v17, %v1316_v17 }
 0x22d   : > { %1707 = vst.msk [vmem:[%s2574_s7 + $0xac] sm:$0xf] %vm1663_vm2, %v2022_v18 }
 0x22e   : > { %1705 = vst.msk [vmem:[%s2574_s7 + $0xa4] sm:$0xf] %vm1663_vm2, %v2020_v19  ;;  %v2244_v20 = vpop.f32.mrb[40].mxu1 }
 0x22f   : > { %v1337_v21 = vadd.f32 %v2244_v20, %v2566_v14  ;;  %v1328_v22 = vpop.f32.mrb[41].mxu1 }
 0x230   : > { %v1329_v23 = vadd.f32 %v2566_v14, %v1328_v22  ;;  %v2245_v24 = vpop.f32.mrb[42].mxu1 }
 0x231   : > { %v2025_v25 = vpack.c.bf16 %v1337_v21, %v1337_v21  ;;  %v1340_v26 = vadd.f32 %v2245_v24, %v2566_v14  ;;  %v1331_v27 = vpop.f32.mrb[43].mxu1 }
 0x232   : > { %v2023_v28 = vpack.c.bf16 %v1329_v23, %v1329_v23  ;;  %v1332_v29 = vadd.f32 %v2566_v14, %v1331_v27 }
 0x233   : > { %1710 = vst.msk [vmem:[%s2574_s7 + $0xb8] sm:$0xf] %vm1663_vm2, %v2025_v25  ;;  %v2026_v30 = vpack.c.bf16 %v1340_v26, %v1340_v26 }
 0x234   : > { %1708 = vst.msk [vmem:[%s2574_s7 + $0xb0] sm:$0xf] %vm1663_vm2, %v2023_v28  ;;  %v2024_v31 = vpack.c.bf16 %v1332_v29, %v1332_v29 }
 0x235   : > { %1711 = vst.msk [vmem:[%s2574_s7 + $0xbc] sm:$0xf] %vm1663_vm2, %v2026_v30 }
 0x236   : > { %1709 = vst.msk [vmem:[%s2574_s7 + $0xb4] sm:$0xf] %vm1663_vm2, %v2024_v31  ;;  %v2248_v32 = vpop.f32.mrb[44].mxu1 }
 0x237   : > { %v1353_v33 = vadd.f32 %v2248_v32, %v2566_v14  ;;  %v1344_v34 = vpop.f32.mrb[45].mxu1 }
 0x238   : > { %v1345_v35 = vadd.f32 %v2566_v14, %v1344_v34  ;;  %v2249_v36 = vpop.f32.mrb[46].mxu1 }
 0x239   : > { %v2029_v37 = vpack.c.bf16 %v1353_v33, %v1353_v33  ;;  %v1356_v38 = vadd.f32 %v2249_v36, %v2566_v14  ;;  %v1347_v39 = vpop.f32.mrb[47].mxu1 }
 0x23a   : > { %v2027_v40 = vpack.c.bf16 %v1345_v35, %v1345_v35  ;;  %v1348_v41 = vadd.f32 %v2566_v14, %v1347_v39 }
 0x23b   : > { %1714 = vst.msk [vmem:[%s2574_s7 + $0xc8] sm:$0xf] %vm1663_vm2, %v2029_v37  ;;  %v2030_v43 = vpack.c.bf16 %v1356_v38, %v1356_v38 }
 0x23c   : > { %1712 = vst.msk [vmem:[%s2574_s7 + $0xc0] sm:$0xf] %vm1663_vm2, %v2027_v40  ;;  %v2028_v44 = vpack.c.bf16 %v1348_v41, %v1348_v41 }
 0x23d   : > { %1715 = vst.msk [vmem:[%s2574_s7 + $0xcc] sm:$0xf] %vm1663_vm2, %v2030_v43 }
 0x23e   : > { %1713 = vst.msk [vmem:[%s2574_s7 + $0xc4] sm:$0xf] %vm1663_vm2, %v2028_v44  ;;  %v2252_v45 = vpop.f32.mrb[48].mxu1 }
 0x23f   : > { %v1369_v46 = vadd.f32 %v2252_v45, %v2566_v14  ;;  %v1360_v47 = vpop.f32.mrb[49].mxu1 }
 0x240   : > { %v1361_v48 = vadd.f32 %v2566_v14, %v1360_v47  ;;  %v2253_v49 = vpop.f32.mrb[50].mxu1 }
 0x241   : > { %v2033_v50 = vpack.c.bf16 %v1369_v46, %v1369_v46  ;;  %v1372_v51 = vadd.f32 %v2253_v49, %v2566_v14  ;;  %v1363_v52 = vpop.f32.mrb[51].mxu1 }
 0x242   : > { %v2031_v53 = vpack.c.bf16 %v1361_v48, %v1361_v48  ;;  %v1364_v54 = vadd.f32 %v2566_v14, %v1363_v52 }
 0x243   : > { %1718 = vst.msk [vmem:[%s2574_s7 + $0xd8] sm:$0xf] %vm1663_vm2, %v2033_v50  ;;  %v2034_v55 = vpack.c.bf16 %v1372_v51, %v1372_v51 }
 0x244   : > { %1716 = vst.msk [vmem:[%s2574_s7 + $0xd0] sm:$0xf] %vm1663_vm2, %v2031_v53  ;;  %v2032_v56 = vpack.c.bf16 %v1364_v54, %v1364_v54 }
 0x245   : > { %1719 = vst.msk [vmem:[%s2574_s7 + $0xdc] sm:$0xf] %vm1663_vm2, %v2034_v55 }
 0x246   : > { %1717 = vst.msk [vmem:[%s2574_s7 + $0xd4] sm:$0xf] %vm1663_vm2, %v2032_v56  ;;  %v2256_v57 = vpop.f32.mrb[52].mxu1 }
 0x247   : > { %v1385_v58 = vadd.f32 %v2256_v57, %v2566_v14  ;;  %v1376_v59 = vpop.f32.mrb[53].mxu1 }
 0x248   : > { %v1377_v60 = vadd.f32 %v2566_v14, %v1376_v59  ;;  %v2257_v61 = vpop.f32.mrb[54].mxu1 }
 0x249   : > { %v2037_v62 = vpack.c.bf16 %v1385_v58, %v1385_v58  ;;  %v1388_v63 = vadd.f32 %v2257_v61, %v2566_v14  ;;  %v1379_v0 = vpop.f32.mrb[55].mxu1 }
 0x24a   : > { %v2035_v1 = vpack.c.bf16 %v1377_v60, %v1377_v60  ;;  %v1380_v2 = vadd.f32 %v2566_v14, %v1379_v0 }
 0x24b   : > { %1722 = vst.msk [vmem:[%s2574_s7 + $0xe8] sm:$0xf] %vm1663_vm2, %v2037_v62  ;;  %v2038_v3 = vpack.c.bf16 %v1388_v63, %v1388_v63 }
 0x24c   : > { %1720 = vst.msk [vmem:[%s2574_s7 + $0xe0] sm:$0xf] %vm1663_vm2, %v2035_v1  ;;  %v2036_v4 = vpack.c.bf16 %v1380_v2, %v1380_v2 }
 0x24d   : > { %1723 = vst.msk [vmem:[%s2574_s7 + $0xec] sm:$0xf] %vm1663_vm2, %v2038_v3 }
 0x24e   : > { %1721 = vst.msk [vmem:[%s2574_s7 + $0xe4] sm:$0xf] %vm1663_vm2, %v2036_v4  ;;  %v2260_v5 = vpop.f32.mrb[56].mxu1 }
 0x24f   : > { %v1401_v6 = vadd.f32 %v2260_v5, %v2566_v14  ;;  %v1392_v7 = vpop.f32.mrb[57].mxu1 }
 0x250   : > { %v1393_v8 = vadd.f32 %v2566_v14, %v1392_v7  ;;  %v2261_v9 = vpop.f32.mrb[58].mxu1 }
 0x251   : > { %v2041_v10 = vpack.c.bf16 %v1401_v6, %v1401_v6  ;;  %v1404_v11 = vadd.f32 %v2261_v9, %v2566_v14  ;;  %v1395_v12 = vpop.f32.mrb[59].mxu1 }
 0x252   : > { %v2039_v13 = vpack.c.bf16 %v1393_v8, %v1393_v8  ;;  %v1396_v15 = vadd.f32 %v2566_v14, %v1395_v12 }
 0x253   : > { %1726 = vst.msk [vmem:[%s2574_s7 + $0xf8] sm:$0xf] %vm1663_vm2, %v2041_v10  ;;  %v2042_v42 = vpack.c.bf16 %v1404_v11, %v1404_v11 }
 0x254   : > { %1724 = vst.msk [vmem:[%s2574_s7 + $0xf0] sm:$0xf] %vm1663_vm2, %v2039_v13  ;;  %v2040_v16 = vpack.c.bf16 %v1396_v15, %v1396_v15 }
 0x255   : > { %1727 = vst.msk [vmem:[%s2574_s7 + $0xfc] sm:$0xf] %vm1663_vm2, %v2042_v42 }
 0x256   : > { %1725 = vst.msk [vmem:[%s2574_s7 + $0xf4] sm:$0xf] %vm1663_vm2, %v2040_v16 }
 0x257 PF: > { %s22_s26 = sadd.s32 1, %s2348_s26  }
 0x258   : > { %p19_p13 = scmp.ge.s32.totalorder %s22_s26, 5  }
 0x25a   :  { %21 = sbr.rel (!%p19_p13) target bundleno = 16 (0x10), region = 82 }

</bundles_post_ra>
